<compile_context>
chip_gen: v6e
topology: v6e:2x2x1
jax: 0.10.0
libtpu: 0.0.40
codegen_flags: <defaults>
</compile_context>

<pallas_src>
import functools

import jax
import jax.numpy as jnp
from jax.experimental import pallas as pl
from jax.experimental.pallas import tpu as pltpu

IN_FEATURES = 10
OUT_FEATURES = 10
DROP_P = 0.5
LANE = 128
MAX_TB = 1024  # batch-tile cap; (10, 1024) f32 blocks ~40 KB, trivially fits VMEM


def _net2_kernel(seed_ref, x_ref, w_ref, b_ref, o_ref, *, training, tb):
    x_t = x_ref[...]                     # (IN, TB)   batch on lanes, f32
    w = w_ref[...]                       # (OUT, IN)  torch layout
    b = b_ref[...]                       # (OUT, 1)

    # out_T = W @ x_T + b  ==  (x @ W^T + b)^T, exactly nn.Linear
    y = jnp.dot(w, x_t, preferred_element_type=jnp.float32) + b   # (OUT, TB)

    if training:
        # Counter-based hash PRNG: distinct per global (row, column) element and
        # per tile (global column index mixes in program_id), seeded from SMEM.
        rows = jax.lax.broadcasted_iota(jnp.int32, y.shape, 0)
        cols = jax.lax.broadcasted_iota(jnp.int32, y.shape, 1) + pl.program_id(0) * tb
        idx = (cols * OUT_FEATURES + rows).astype(jnp.uint32)
        h = idx ^ seed_ref[0].astype(jnp.uint32)
        h = (h ^ (h >> 16)) * jnp.uint32(0x7FEB352D)
        h = (h ^ (h >> 15)) * jnp.uint32(0x846CA68B)
        h = h ^ (h >> 16)
        keep = (h & jnp.uint32(0x80000000)) == 0          # fair coin -> p = 0.5
        y = jnp.where(keep, y * (1.0 / (1.0 - DROP_P)), jnp.zeros_like(y))

    # numerically-stable log_softmax over the feature (sublane) axis
    m = jnp.max(y, axis=0, keepdims=True)                 # (1, TB)
    z = y - m
    lse = jnp.log(jnp.sum(jnp.exp(z), axis=0, keepdims=True))
    o_ref[...] = (z - lse).astype(o_ref.dtype)


def net2_forward(x, weight, bias, *, training=False, seed=0):
    """x: (B, 10) f32; weight: (10, 10) f32 (torch layout out x in); bias: (10,) f32."""
    B = x.shape[0]

    # Batch tile: multiple of 128 lanes, capped at MAX_TB; pad B up to a tile multiple.
    tb = min(MAX_TB, pl.cdiv(B, LANE) * LANE)
    b_pad = pl.cdiv(B, tb) * tb

    x_pad = jnp.zeros((b_pad, IN_FEATURES), jnp.float32).at[:B].set(
        x.astype(jnp.float32))
    x_t = x_pad.T                                          # (IN, B_pad), lane-dense
    w = weight.astype(jnp.float32)                         # (OUT, IN)
    b2d = bias.reshape(OUT_FEATURES, 1).astype(jnp.float32)
    seed_arr = jnp.array([seed], dtype=jnp.int32)

    kernel = functools.partial(_net2_kernel, training=training, tb=tb)

    out_t = pl.pallas_call(
        kernel,
        out_shape=jax.ShapeDtypeStruct((OUT_FEATURES, b_pad), jnp.float32),
        grid_spec=pltpu.PrefetchScalarGridSpec(
            num_scalar_prefetch=1,                          # seed lands in SMEM
            grid=(b_pad // tb,),                            # iterate batch tiles
            in_specs=[
                pl.BlockSpec((IN_FEATURES, tb), lambda i, s: (0, i)),
                pl.BlockSpec((OUT_FEATURES, IN_FEATURES), lambda i, s: (0, 0)),
                pl.BlockSpec((OUT_FEATURES, 1), lambda i, s: (0, 0)),
            ],
            out_specs=pl.BlockSpec((OUT_FEATURES, tb), lambda i, s: (0, i)),
        ),
        compiler_params=pltpu.CompilerParams(
            dimension_semantics=("parallel",)),             # 2 TCs on v7x
    )(seed_arr, x_t, w, b2d)

    return out_t.T[:B]                                      # back to (B, 10)


if __name__ == "__main__":
    key = jax.random.PRNGKey(0)
    k_w, k_b, k_x = jax.random.split(key, 3)

    # torch.nn.Linear default init: U(-1/sqrt(in), 1/sqrt(in))
    bound = 1.0 / jnp.sqrt(jnp.float32(IN_FEATURES))
    weight = jax.random.uniform(k_w, (OUT_FEATURES, IN_FEATURES),
                                minval=-bound, maxval=bound, dtype=jnp.float32)
    bias = jax.random.uniform(k_b, (OUT_FEATURES,),
                              minval=-bound, maxval=bound, dtype=jnp.float32)

    B = 8
    x = jax.random.normal(k_x, (B, IN_FEATURES), dtype=jnp.float32)

    # eval-mode (dropout = identity), matches F.log_softmax(fc(x), dim=-1)
    out = net2_forward(x, weight, bias, training=False)
    out = jax.block_until_ready(out)

    ref = jax.nn.log_softmax(x @ weight.T + bias, axis=-1)
    assert out.shape == (B, OUT_FEATURES)
    assert jnp.allclose(out, ref, atol=1e-5, rtol=1e-5), "mismatch vs reference"

    # also exercise the training (dropout) path once; output is stochastic by design
    out_train = jax.block_until_ready(
        net2_forward(x, weight, bias, training=True, seed=1234))
    assert out_train.shape == (B, OUT_FEATURES)
    assert bool(jnp.all(jnp.isfinite(out_train)))

    print("KERNEL_OK")
</pallas_src>

<mosaic_0001>
module attributes {stable_mosaic.version = 11 : i64} {
  func.func @_net2_kernel(%arg0: i32, %arg1: memref<1xi32, #tpu.memory_space<smem>>, %arg2: memref<10x128xf32, #tpu.memory_space<vmem>>, %arg3: memref<10x10xf32, #tpu.memory_space<vmem>>, %arg4: memref<10x1xf32, #tpu.memory_space<vmem>>, %arg5: memref<10x128xf32, #tpu.memory_space<vmem>>) attributes {dimension_semantics = [#tpu.dimension_semantics<parallel>], iteration_bounds = array<i64: 1>, scalar_prefetch = 1 : i64, scratch_operands = 0 : i64, tpu.core_type = #tpu.core_type<tc>, window_params = [{transform_indices = @transform_0, window_bounds = array<i64: 10, 128>}, {pipeline_mode = #tpu.pipeline_mode<synchronous>, transform_indices = @transform_1, window_bounds = array<i64: 10, 10>}, {pipeline_mode = #tpu.pipeline_mode<synchronous>, transform_indices = @transform_2, window_bounds = array<i64: 10, 1>}, {transform_indices = @transform_3, window_bounds = array<i64: 10, 128>}]} {
    %c0 = arith.constant 0 : index
    %c0_0 = arith.constant 0 : index
    %0 = vector.load %arg2[%c0, %c0_0] : memref<10x128xf32, #tpu.memory_space<vmem>>, vector<10x128xf32>
    %c0_1 = arith.constant 0 : index
    %c0_2 = arith.constant 0 : index
    %1 = vector.load %arg3[%c0_1, %c0_2] : memref<10x10xf32, #tpu.memory_space<vmem>>, vector<10x10xf32>
    %c0_3 = arith.constant 0 : index
    %c0_4 = arith.constant 0 : index
    %2 = vector.load %arg4[%c0_3, %c0_4] : memref<10x1xf32, #tpu.memory_space<vmem>>, vector<10x1xf32>
    %cst = arith.constant dense<0.000000e+00> : vector<10x128xf32>
    %3 = tpu.matmul %1, %0, %cst {dimension_numbers = #tpu.dot_dimension_numbers<[1], [0], [0], [1], [0, 0, 1, 1], [], []>} : vector<10x10xf32>, vector<10x128xf32>, vector<10x128xf32> -> vector<10x128xf32>
    %4 = vector.broadcast %2 : vector<10x1xf32> to vector<10x128xf32>
    %5 = arith.addf %3, %4 : vector<10x128xf32>
    %cst_5 = arith.constant dense<0xFF800000> : vector<128xf32>
    %6 = vector.multi_reduction <maximumf>, %5, %cst_5 [0] : vector<10x128xf32> to vector<128xf32>
    %7 = vector.shape_cast %6 : vector<128xf32> to vector<1x128xf32>
    %8 = vector.broadcast %7 : vector<1x128xf32> to vector<10x128xf32>
    %9 = arith.subf %5, %8 : vector<10x128xf32>
    %10 = math.exp %9 : vector<10x128xf32>
    %cst_6 = arith.constant dense<0.000000e+00> : vector<128xf32>
    %11 = vector.multi_reduction <add>, %10, %cst_6 [0] : vector<10x128xf32> to vector<128xf32>
    %12 = vector.shape_cast %11 : vector<128xf32> to vector<1x128xf32>
    %13 = math.log %12 : vector<1x128xf32>
    %14 = vector.broadcast %13 : vector<1x128xf32> to vector<10x128xf32>
    %15 = arith.subf %9, %14 : vector<10x128xf32>
    %c0_7 = arith.constant 0 : index
    %c0_8 = arith.constant 0 : index
    %16 = vector.load %arg5[%c0_7, %c0_8] : memref<10x128xf32, #tpu.memory_space<vmem>>, vector<10x128xf32>
    tpu.vector_store %arg5[%c0_7, %c0_8], %15 {strides = array<i32>} : memref<10x128xf32, #tpu.memory_space<vmem>>, vector<10x128xf32>,
    return
  }
  func.func @transform_0(%arg0: i32, %arg1: memref<1xi32, #tpu.memory_space<smem>>) -> (i32, i32) {
    %c0_i32 = arith.constant 0 : i32
    %c0_i32_0 = arith.constant 0 : i32
    return %c0_i32, %arg0 : i32, i32
  }
  func.func @transform_1(%arg0: i32, %arg1: memref<1xi32, #tpu.memory_space<smem>>) -> (i32, i32) {
    %c0_i32 = arith.constant 0 : i32
    %c0_i32_0 = arith.constant 0 : i32
    %c0_i32_1 = arith.constant 0 : i32
    return %c0_i32, %c0_i32_0 : i32, i32
  }
  func.func @transform_2(%arg0: i32, %arg1: memref<1xi32, #tpu.memory_space<smem>>) -> (i32, i32) {
    %c0_i32 = arith.constant 0 : i32
    %c0_i32_0 = arith.constant 0 : i32
    %c0_i32_1 = arith.constant 0 : i32
    return %c0_i32, %c0_i32_0 : i32, i32
  }
  func.func @transform_3(%arg0: i32, %arg1: memref<1xi32, #tpu.memory_space<smem>>) -> (i32, i32) {
    %c0_i32 = arith.constant 0 : i32
    %c0_i32_0 = arith.constant 0 : i32
    return %c0_i32, %arg0 : i32, i32
  }
}

</mosaic_0001>

<bundles_post_ra>
// kernel: tpu_custom_call.1
= control target key start
LH: loop header
LB: loop body
LE: loop exit
PB: predicated region body
PF: predicated region fallthrough
CT: control target
= control target key end

     0   :  { %10 = vsyncpa [#allocation5], 0  ;;  %s306_s0 = inlined_call_operand.<no memory space> [shape: s32[1], index: 0, kind: input, shape index: {}]   ;;  %s307_s1 = inlined_call_operand.vmem [shape: f32[10,128], index: 1, kind: input, shape index: {}]   ;;  %s308_s2 = inlined_call_operand.hbm [shape: f32[10,10], index: 2, kind: input, shape index: {}]   ;;  %s309_s3 = inlined_call_operand.vmem [shape: f32[10,1], index: 3, kind: input, shape index: {}]   ;;  %s310_s4 = inlined_call_operand.hbm [shape: f32[10,128], index: 4, kind: output, shape index: {}]  }
   0x1   :  { %11 = vsyncpa [#allocation6], 0  ;;  %s248_s15 = smov [#allocation4]  }
   0x2   :  { %s19_s16 = sshll.u32 %s248_s15, 4  ;;  %s20_s16 = int_to_ptr.vmem [resolvable:$true] %s19_s16 }
   0x3   :  { %s212_s17 = scalar_lea.vmem %s20_s16, 256  ;;  %p217_p1 = scmp.lt.s32.totalorder %s20_s16, %s20_s16 }
   0x4   :  { %p213_p0 = scmp.ne.s32.totalorder %s20_s16, %s212_s17  ;;  %p218_p2 = scmp.lt.s32.totalorder %s212_s17, %s212_s17 }
   0x6   :  { %p219_p3 = por %p218_p2, %p217_p1 }
   0x8   :  { %p220_p4 = pnand %p219_p3, %p213_p0 }
   0xa   :  { %223 = shalt.err (!%p220_p4)
}
   0xb   :  { %s249_s0 = smov 128   ;;  %s250_s18 = smov 8  }
   0xc   :  { %25 = dma.hbm_to_vmem [thread:$0]  %s308_s2, 256, %s20_s16, [#allocation5], %s249_s0, %s249_s0, %s250_s18  }
   0xd   :  { %244 = dma.done.wait [#allocation5], 256  }
   0xe   :  { %245 = vsyncadd [#allocation5], 4294967040  ;;  %v251_v0 = vmov 0   ;;  %vm54_vm0 = vcmask 1041408   ;;  %vm47_vm1 = vcmask 80896   ;;  %v31_v2 = vld [vmem:[%s307_s1] sm:$0xff] }
   0xf   :  { %197 = vset.pattern.permute.xlu0 %v251_v0  ;;  %v32_v1 = vld [vmem:[%s307_s1 + $0x8] sm:$0x3]  ;;  %v33_v3 = vld [vmem:[#allocation4] sm:$0xff]  ;;  %s252_s1 = smov [#allocation7]  }
  0x10   :  { %185 = vmatprep.subr.msk.mxu0 %vm54_vm0, %v32_v1  ;;  %189 = vmatprep.mubr.msk.f32.mxu0 %vm47_vm1, %v33_v3  ;;  %v36_v4 = vld [vmem:[%s309_s3 + $0x8] sm:$0x3]  ;;  %v35_v6 = vld [vmem:[%s309_s3] sm:$0xff]  ;;  %s166_s3 = sshll.u32 %s252_s1, 4  ;;  %s167_s3 = int_to_ptr.vmem [resolvable:$true] %s166_s3 }
  0x11   :  { %186 = vmatpush3.msk.msra.mxu0 %vm54_vm0, %v32_v1  ;;  %v34_v5 = vld [vmem:[#allocation4 + $0x8] sm:$0x3]  ;;  %44 = vperm.xlu0 %197, %v36_v4   ;;  %s224_s28 = scalar_lea.vmem %s167_s3, 256  ;;  %p229_p6 = scmp.lt.s32.totalorder %s167_s3, %s167_s3 }
  0x12   :  { %187 = vmatprep.subr.mxu0 %v31_v2  ;;  %p225_p5 = scmp.ne.s32.totalorder %s167_s3, %s224_s28  ;;  %p230_p7 = scmp.lt.s32.totalorder %s224_s28, %s224_s28 }
  0x13   :  { %188 = vmatpush3.msra.mxu0 %v31_v2 }
  0x14   :  { %190 = vmatmul.mubr.msk.f32.vlgmr.msra.gmra.mxu0 %vm47_vm1, %v34_v5  ;;  %p231_p8 = por %p230_p7, %p229_p6 }
  0x15   :  { %39 = vperm.xlu0 %197, %v35_v6  }
  0x16   :  { %p232_p9 = pnand %p231_p8, %p225_p5 }
  0x8c   :  { %v45_v7 = vpop.permute.xlu0 %44 }
  0x90   :  { %v40_v10 = vpop.permute.xlu0 %39 }
  0xd4   :  { %v191_v8 = vpop.f32.mrf.mxu0 }
  0xd5   :  { %v130_v9 = vadd.f32 %v191_v8, %v45_v7 }
  0xd6   :  { %v124_v11 = vpop.f32.mrf.mxu0 }
  0xd7   :  { %v133_v12 = vsel %vm54_vm0, %v130_v9, -inf  ;;  %v125_v13 = vadd.f32 %v124_v11, %v40_v10 }
  0xd9   :  { %v134_v14 = vmax.f32 %v125_v13, %v133_v12 }
  0xdb   :  { %v135_v15 = vrot.slane %v134_v14, 4 }
  0xdd   :  { %v136_v16 = vmax.f32 %v134_v14, %v135_v15 }
  0xdf   :  { %v137_v17 = vrot.slane %v136_v16, 2 }
  0xe1   :  { %v138_v18 = vmax.f32 %v136_v16, %v137_v17 }
  0xe3   :  { %v139_v19 = vrot.slane %v138_v18, 1 }
  0xe5   :  { %v140_v20 = vmax.f32 %v138_v18, %v139_v19 }
  0xe7   :  { %v141_v21 = vsub.f32 %v125_v13, %v140_v20  ;;  %v142_v22 = vsub.f32 %v130_v9, %v140_v20 }
  0xe9   :  { %v143_v23 = vmul.f32 1.442695, %v141_v21  ;;  %v145_v24 = vmul.f32 1.442695, %v142_v22 }
  0xeb   :  { %198 = vpow2.f32 %v143_v23 }
  0xec   :  { %200 = vpow2.f32 %v145_v24 }
  0xf8   :  { %v199_v25 = vpop.eup %198 }
  0xf9   :  { %v201_v26 = vpop.eup %200 }
  0xfa   :  { %v147_v27 = vsel %vm54_vm0, %v201_v26, 0.0 }
  0xfb   :  { %v148_v28 = vadd.f32 %v199_v25, %v147_v27 }
  0xfd   :  { %v149_v29 = vrot.slane %v148_v28, 4 }
  0xff   :  { %v150_v30 = vadd.f32 %v149_v29, %v148_v28 }
 0x101   :  { %v151_v31 = vrot.slane %v150_v30, 2 }
 0x103   :  { %v152_v32 = vadd.f32 %v151_v31, %v150_v30 }
 0x105   :  { %v153_v33 = vrot.slane %v152_v32, 1 }
 0x107   :  { %v154_v34 = vadd.f32 %v153_v33, %v152_v32 }
 0x109   :  { %202 = vlog2.f32 %v154_v34 }
 0x116   :  { %v203_v35 = vpop.eup %202 }
 0x117   :  { %v156_v36 = vmul.f32 0.6931472, %v203_v35 }
 0x119   :  { %v157_v37 = vsub.f32 %v141_v21, %v156_v36  ;;  %v158_v38 = vsub.f32 %v142_v22, %v156_v36 }
 0x11b   :  { %159 = vst [vmem:[#allocation7] sm:$0xff] %v157_v37  ;;  %160 = vst [vmem:[#allocation7 + $0x8] sm:$0x3] %v158_v38 }
 0x11c   :  { %235 = shalt.err (!%p232_p9)
}
 0x11d   :  { %172 = dma.vmem_to_hbm [thread:$0]  %s167_s3, 256, %s310_s4, [#allocation6], %s249_s0, %s249_s0, %s250_s18  }
 0x11e   :  { %246 = dma.done.wait [#allocation6], 256  }
 0x11f   :  { %247 = vsyncadd [#allocation6], 4294967040 }
 0x120   :  { %176 = vsyncpa [#allocation5], 1 }
 0x121   :  { %177 = vsyncpa [#allocation6], 1 }

</bundles_post_ra>
